<compile_context>
chip_gen: v6e
topology: v6e:2x2x1
jax: 0.10.0
libtpu: 0.0.40
codegen_flags: <defaults>
</compile_context>

<pallas_src>
import functools

import jax
import jax.numpy as jnp
from jax import lax
from jax.experimental import pallas as pl
from jax.experimental.pallas import tpu as pltpu


# ----------------------------- helpers ---------------------------------------

def _round_up(x, m):
    return ((x + m - 1) // m) * m


def _pick_s_tile(S, b_tile, H, enc_esize, target_bytes, ws_budget_bytes):
    """S-rows per encoder tile.

    Sized so one (s_tile, b_tile, H) buffer is ~target_bytes (default 8 MiB: the
    ~0.35 us fixed grid-step cost is then <5% of the tile DMA time even on v7x),
    then shrunk until the VMEM working set (2x double-buffered enc tile +
    2x resident score slab + weights) fits the budget (v7x: 64 MiB physical VMEM).
    """
    row_bytes = b_tile * H * enc_esize
    t = (target_bytes // max(row_bytes, 1)) // 8 * 8
    t = max(8, t)                                 # sublane-aligned slab stores
    t = min(t, _round_up(S, 8))

    def working_set(tile):
        s_pad = _round_up(S, tile)
        enc = 2 * tile * row_bytes                # double-buffered input tile
        slab = 2 * s_pad * b_tile * 4             # resident score/softmax slab
        wts = (2 * H * H + 4 * H + 2 * b_tile * H) * 4
        return enc + slab + wts

    while t > 8 and working_set(t) > ws_budget_bytes:
        t = max(8, (t // 2) // 8 * 8)
    return t


def _finalize_softmax(o_ref, s_valid):
    """Masked, stable softmax over axis 0 of the resident (S_pad, b_tile) slab.

    Padded S rows (>= s_valid) may hold garbage/NaN from the grid-remainder tile;
    jnp.where is a select so they are cleanly forced to -inf -> probability 0.
    """
    x = o_ref[...]                                               # (S_pad, b_tile)
    row = lax.broadcasted_iota(jnp.int32, x.shape, 0)
    x = jnp.where(row < s_valid, x, -jnp.inf)
    x = x - jnp.max(x, axis=0, keepdims=True)
    e = jnp.exp(x)
    o_ref[...] = e / jnp.sum(e, axis=0, keepdims=True)


# ----------------------------- kernels ----------------------------------------

def _dot_kernel(h_ref, e_ref, o_ref, *, s_tile, s_valid):
    si = pl.program_id(1)
    # scores[s, b] = sum_h enc[s, b, h] * hidden[b, h]
    # hidden is always f32, so the product/reduction stay f32 even for bf16 enc.
    scores = jnp.sum(e_ref[...] * h_ref[...][None, :, :], axis=2)      # (s_tile, bt)
    off = pl.multiple_of(si * s_tile, 8)
    o_ref[pl.ds(off, s_tile), :] = scores

    @pl.when(si == pl.num_programs(1) - 1)
    def _():
        _finalize_softmax(o_ref, s_valid)


def _general_kernel(h_ref, w_ref, e_ref, o_ref, hw_ref, *, s_tile, s_valid):
    si = pl.program_id(1)

    @pl.when(si == 0)
    def _():
        # Fold the Linear into the query (once per batch block):
        #   hW[b, j] = sum_k hidden[b, k] * W[k, j].
        # (nn.Linear bias contributes a per-batch-row constant -> cancels in the
        #  softmax over S, so it is dropped.)
        hw_ref[...] = jnp.dot(h_ref[...], w_ref[...],
                              preferred_element_type=jnp.float32)      # (bt, H)

    scores = jnp.sum(e_ref[...] * hw_ref[...][None, :, :], axis=2)     # (s_tile, bt)
    off = pl.multiple_of(si * s_tile, 8)
    o_ref[pl.ds(off, s_tile), :] = scores

    @pl.when(si == pl.num_programs(1) - 1)
    def _():
        _finalize_softmax(o_ref, s_valid)


def _concat_kernel(h_ref, wh_ref, we_ref, b_ref, v_ref, e_ref, o_ref, pre_ref,
                   *, s_tile, s_valid):
    si = pl.program_id(1)
    bt, H = e_ref.shape[1], e_ref.shape[2]

    @pl.when(si == 0)
    def _():
        # Query-side projection + bias, once per batch block:
        #   pre[b, k] = sum_j hidden[b, j] * Wh[k, j] + bias[k]
        hwh = lax.dot_general(h_ref[...], wh_ref[...],
                              (((1,), (1,)), ((), ())),
                              preferred_element_type=jnp.float32)      # (bt, H)
        pre_ref[...] = hwh + b_ref[...]

    # Encoder-side projection on the MXU (weights untransposed; contraction via
    # dimension numbers).  The reshape is done in f32 (layout-safe path); the
    # matmul inputs are cast to the streamed weight dtype (bf16 on v6e/v7x when
    # compute_dtype=bf16, with f32 accumulation).  Layout-preserving when bt%8==0.
    e2 = e_ref[...].astype(jnp.float32).reshape(s_tile * bt, H)
    ew = lax.dot_general(e2.astype(we_ref.dtype), we_ref[...],
                         (((1,), (1,)), ((), ())),
                         preferred_element_type=jnp.float32)           # (s_tile*bt, H)
    energy = jnp.tanh(ew.reshape(s_tile, bt, H) + pre_ref[...][None, :, :])  # f32 EUP
    scores = jnp.sum(energy * v_ref[...][None, :, :], axis=2)          # (s_tile, bt)

    off = pl.multiple_of(si * s_tile, 8)
    o_ref[pl.ds(off, s_tile), :] = scores

    @pl.when(si == pl.num_programs(1) - 1)
    def _():
        _finalize_softmax(o_ref, s_valid)


# ----------------------------- wrapper -----------------------------------------

def attn_forward(method, hidden, encoder_outputs, params, *,
                 target_tile_bytes=8 * 1024 * 1024,
                 compute_dtype=jnp.float32):
    """hidden: (1, B, H) f32; encoder_outputs: (S, B, H) (PyTorch layout).
    Returns (B, 1, S) attention weights, identical to Attn.forward.

    compute_dtype=jnp.bfloat16 streams encoder_outputs (and the encoder-side
    'concat' weight) in bf16: half the HBM bytes for this bandwidth-bound kernel
    and native MXU inputs on v6e/v7x.  Scores, tanh and softmax stay in f32.
    """
    S, B, H = encoder_outputs.shape
    h_bm = hidden[0].astype(jnp.float32)                  # (B, H), query stays f32

    enc_esize = jnp.dtype(compute_dtype).itemsize
    enc = encoder_outputs.astype(compute_dtype)

    # v7x megacore: shard the batch across the two TensorCores with a "parallel"
    # grid axis, but only when the blocks stay sublane-aligned for the enc dtype.
    gran = 16 if enc_esize == 2 else 8
    nb = 2 if (B % (2 * gran) == 0) else 1
    b_tile = B // nb

    ws_budget = 48 * 1024 * 1024                          # safe under v7x 64 MiB VMEM
    s_tile = _pick_s_tile(S, b_tile, H, enc_esize, target_tile_bytes, ws_budget)
    ns = -(-S // s_tile)
    s_pad = ns * s_tile

    grid = (nb, ns)
    enc_spec = pl.BlockSpec((s_tile, b_tile, H), lambda b, s: (s, b, 0))
    hid_spec = pl.BlockSpec((b_tile, H), lambda b, s: (b, 0))

    def res(shape):                                       # VMEM-resident block
        n = len(shape)
        return pl.BlockSpec(shape, lambda b, s, _n=n: (0,) * _n)

    # Per-batch-block resident score slab: (S_pad, b_tile) with a leading squeezed
    # batch-block dim so the block always equals the array's last two dims.
    out_spec = pl.BlockSpec((None, s_pad, b_tile), lambda b, s: (b, 0, 0))
    out_shape = jax.ShapeDtypeStruct((nb, s_pad, b_tile), jnp.float32)

    # VMEM budget derived from the actual working set (+25% / 4 MiB margin).
    tile_bytes = 2 * s_tile * b_tile * H * enc_esize
    slab_bytes = 2 * s_pad * b_tile * 4
    weight_bytes = (2 * H * H + 4 * H + 2 * b_tile * H) * 4
    vmem_limit = min(
        max(int(1.25 * (tile_bytes + slab_bytes + weight_bytes)) + 4 * 1024 * 1024,
            16 * 1024 * 1024),
        100 * 1024 * 1024)

    cparams = pltpu.CompilerParams(
        dimension_semantics=("parallel", "arbitrary"),
        vmem_limit_bytes=vmem_limit,
    )

    stream_bytes = S * B * H * enc_esize + B * H * 4 + B * s_pad * 4

    if method == 'dot':
        cost = pl.CostEstimate(flops=2 * S * B * H,
                               transcendentals=S * B,
                               bytes_accessed=stream_bytes)
        kern = functools.partial(_dot_kernel, s_tile=s_tile, s_valid=S)
        probs = pl.pallas_call(
            kern, grid=grid,
            in_specs=[hid_spec, enc_spec],
            out_specs=out_spec, out_shape=out_shape,
            compiler_params=cparams, cost_estimate=cost,
        )(h_bm, enc)
    elif method == 'general':
        W = params['W'].astype(jnp.float32)               # (H, H) Linear weight
        cost = pl.CostEstimate(flops=2 * S * B * H + 2 * B * H * H,
                               transcendentals=S * B,
                               bytes_accessed=stream_bytes + H * H * 4)
        kern = functools.partial(_general_kernel, s_tile=s_tile, s_valid=S)
        probs = pl.pallas_call(
            kern, grid=grid,
            in_specs=[hid_spec, res((H, H)), enc_spec],
            out_specs=out_spec, out_shape=out_shape,
            scratch_shapes=[pltpu.VMEM((b_tile, H), jnp.float32)],
            compiler_params=cparams, cost_estimate=cost,
        )(h_bm, W, enc)
    elif method == 'concat':
        W = params['W']                                   # (H, 2H) Linear weight
        Wh = W[:, :H].astype(jnp.float32)                 # query-side half (f32)
        We = W[:, H:].astype(compute_dtype)               # encoder-side half
        bias2d = params['b'].reshape(1, H).astype(jnp.float32)
        v2d = params['v'].reshape(1, H).astype(jnp.float32)
        cost = pl.CostEstimate(
            flops=2 * S * B * H * H + 2 * B * H * H + 3 * S * B * H,
            transcendentals=S * B * H + S * B,
            bytes_accessed=stream_bytes + 2 * H * H * 4)
        kern = functools.partial(_concat_kernel, s_tile=s_tile, s_valid=S)
        probs = pl.pallas_call(
            kern, grid=grid,
            in_specs=[hid_spec, res((H, H)), res((H, H)), res((1, H)), res((1, H)),
                      enc_spec],
            out_specs=out_spec, out_shape=out_shape,
            scratch_shapes=[pltpu.VMEM((b_tile, H), jnp.float32)],
            compiler_params=cparams, cost_estimate=cost,
        )(h_bm, Wh, We, bias2d, v2d, enc)
    else:
        raise ValueError(method, 'is not an appropriate attention method.')

    # (nb, S_pad, b_tile) softmax slab -> (B, 1, S); this epilogue touches only B*S
    # floats (negligible vs the S*B*H stream), unlike transposing encoder_outputs.
    probs = jnp.transpose(probs[:, :S, :], (0, 2, 1)).reshape(B, S)
    return probs[:, None, :]


# ----------------------------- pure-JAX reference --------------------------------

def attn_reference(method, hidden, encoder_outputs, params):
    if method == 'dot':
        scores = jnp.sum(hidden * encoder_outputs, axis=2)                  # (S, B)
    elif method == 'general':
        energy = encoder_outputs @ params['W'].T + params['b']
        scores = jnp.sum(hidden * energy, axis=2)
    else:  # concat
        h_exp = jnp.broadcast_to(hidden, encoder_outputs.shape)
        cat = jnp.concatenate([h_exp, encoder_outputs], axis=2)
        energy = jnp.tanh(cat @ params['W'].T + params['b'])
        scores = jnp.sum(params['v'] * energy, axis=2)
    return jax.nn.softmax(scores.T, axis=1)[:, None, :]                     # (B, 1, S)


# ----------------------------- main ----------------------------------------------

if __name__ == "__main__":
    master = jax.random.PRNGKey(0)

    def make_inputs(B, S, H, key):
        k1, k2, k3, k4, k5 = jax.random.split(key, 5)
        hidden = jax.random.normal(k1, (1, B, H), jnp.float32)          # (1, B, H)
        enc = jax.random.normal(k2, (S, B, H), jnp.float32)             # (S, B, H)
        # Note: `self.v` is an uninitialized FloatTensor in PyTorch; random init here.
        params = {
            'dot': {},
            'general': {
                'W': 0.1 * jax.random.normal(k3, (H, H), jnp.float32),
                'b': 0.1 * jax.random.normal(k4, (H,), jnp.float32),
            },
            'concat': {
                'W': 0.1 * jax.random.normal(k3, (H, 2 * H), jnp.float32),
                'b': 0.1 * jax.random.normal(k4, (H,), jnp.float32),
                'v': jax.random.normal(k5, (H,), jnp.float32),
            },
        }
        return hidden, enc, params

    # Shape A: module-like toy shapes.  Shape B: exercises the "parallel"
    # batch-block axis (nb=2) and a multi-step S grid simultaneously.
    shapes = [(2, 10, 32), (16, 40, 32)]
    keys = jax.random.split(master, len(shapes))

    for idx, ((B, S, H), k) in enumerate(zip(shapes, keys)):
        hidden, enc, params = make_inputs(B, S, H, k)
        for method in ['dot', 'general', 'concat']:
            ref = attn_reference(method, hidden, enc, params[method])

            # f32 path: default (large) tile and a tiny tile that forces a
            # multi-step S grid (resident-slab + masked-softmax path, S % tile != 0).
            for tgt in (8 * 1024 * 1024, 512):
                out = attn_forward(method, hidden, enc, params[method],
                                   target_tile_bytes=tgt)
                out = jax.block_until_ready(out)
                assert out.shape == (B, 1, S), (method, out.shape)
                if not jnp.allclose(out, ref, atol=1e-5, rtol=1e-5):
                    raise SystemExit(
                        f"MISMATCH method={method} shape={(B, S, H)} tile={tgt}")

            # bf16 encoder streaming (half HBM bytes; MXU-native on v6e/v7x) —
            # checked loosely against the f32 reference (shape A only).
            if idx == 0:
                out16 = attn_forward(method, hidden, enc, params[method],
                                     compute_dtype=jnp.bfloat16)
                out16 = jax.block_until_ready(out16)
                assert out16.shape == (B, 1, S), (method, out16.shape)
                ok = (jnp.allclose(jnp.sum(out16, axis=-1), 1.0, atol=1e-3)
                      and jnp.allclose(out16, ref, atol=0.1))
                if not ok:
                    raise SystemExit(f"bf16 MISMATCH method={method} shape={(B, S, H)}")

    print("KERNEL_OK")
</pallas_src>

<mosaic_0001>
module attributes {stable_mosaic.version = 11 : i64} {
  func.func @_dot_kernel(%arg0: i32, %arg1: i32, %arg2: memref<2x32xf32, #tpu.memory_space<vmem>>, %arg3: memref<16x2x32xf32, #tpu.memory_space<vmem>>, %arg4: memref<1x16x2xf32, #tpu.memory_space<vmem>>) attributes {dimension_semantics = [#tpu.dimension_semantics<parallel>, #tpu.dimension_semantics<arbitrary>], iteration_bounds = array<i64: 1, 1>, scalar_prefetch = 0 : i64, scratch_operands = 0 : i64, tpu.core_type = #tpu.core_type<tc>, window_params = [{transform_indices = @transform_0, window_bounds = array<i64: 2, 32>}, {transform_indices = @transform_1, window_bounds = array<i64: 16, 2, 32>}, {transform_indices = @transform_2, window_bounds = array<i64: 1, 16, 2>}]} {
    %c0 = arith.constant 0 : index
    %c0_0 = arith.constant 0 : index
    %c0_1 = arith.constant 0 : index
    %0 = vector.load %arg3[%c0, %c0_0, %c0_1] : memref<16x2x32xf32, #tpu.memory_space<vmem>>, vector<16x2x32xf32>
    %c0_2 = arith.constant 0 : index
    %c0_3 = arith.constant 0 : index
    %1 = vector.load %arg2[%c0_2, %c0_3] : memref<2x32xf32, #tpu.memory_space<vmem>>, vector<2x32xf32>
    %2 = vector.shape_cast %1 : vector<2x32xf32> to vector<1x2x32xf32>
    %3 = vector.broadcast %2 : vector<1x2x32xf32> to vector<16x2x32xf32>
    %4 = arith.mulf %0, %3 : vector<16x2x32xf32>
    %cst = arith.constant dense<0.000000e+00> : vector<16x2xf32>
    %5 = vector.multi_reduction <add>, %4, %cst [2] : vector<16x2x32xf32> to vector<16x2xf32>
    %c16_i32 = arith.constant 16 : i32
    %6 = arith.muli %arg1, %c16_i32 : i32
    %7 = tpu.assume_multiple %6, 8 : i32
    %c0_4 = arith.constant 0 : index
    %8 = arith.index_cast %7 : i32 to index
    %c0_5 = arith.constant 0 : index
    %9 = vector.load %arg4[%c0_4, %8, %c0_5] : memref<1x16x2xf32, #tpu.memory_space<vmem>>, vector<1x16x2xf32>
    %10 = vector.shape_cast %9 : vector<1x16x2xf32> to vector<16x2xf32>
    %11 = vector.shape_cast %5 : vector<16x2xf32> to vector<1x16x2xf32>
    tpu.vector_store %arg4[%c0_4, %8, %c0_5], %11 {strides = array<i32>} : memref<1x16x2xf32, #tpu.memory_space<vmem>>, vector<1x16x2xf32>,
    %c0_i32 = arith.constant 0 : i32
    %12 = arith.cmpi eq, %arg1, %c0_i32 : i32
    %13 = arith.extui %12 : i1 to i32
    %c0_i32_6 = arith.constant 0 : i32
    %14 = arith.cmpi ne, %13, %c0_i32_6 : i32
    scf.if %14 {
      %c0_7 = arith.constant 0 : index
      %c0_8 = arith.constant 0 : index
      %c0_9 = arith.constant 0 : index
      %15 = vector.load %arg4[%c0_7, %c0_8, %c0_9] : memref<1x16x2xf32, #tpu.memory_space<vmem>>, vector<1x16x2xf32>
      %16 = vector.shape_cast %15 : vector<1x16x2xf32> to vector<16x2xf32>
      %17 = tpu.iota {dimensions = array<i32: 0>} : vector<16x2xi32>
      %c10_i32 = arith.constant 10 : i32
      %18 = vector.broadcast %c10_i32 : i32 to vector<16x2xi32>
      %19 = arith.cmpi slt, %17, %18 : vector<16x2xi32>
      %cst_10 = arith.constant 0xFF800000 : f32
      %20 = vector.broadcast %cst_10 : f32 to vector<16x2xf32>
      %21 = arith.select %19, %16, %20 : vector<16x2xi1>, vector<16x2xf32>
      %cst_11 = arith.constant dense<0xFF800000> : vector<2xf32>
      %22 = vector.multi_reduction <maximumf>, %21, %cst_11 [0] : vector<16x2xf32> to vector<2xf32>
      %23 = vector.shape_cast %22 : vector<2xf32> to vector<1x2xf32>
      %24 = vector.broadcast %23 : vector<1x2xf32> to vector<16x2xf32>
      %25 = arith.subf %21, %24 : vector<16x2xf32>
      %26 = math.exp %25 : vector<16x2xf32>
      %cst_12 = arith.constant dense<0.000000e+00> : vector<2xf32>
      %27 = vector.multi_reduction <add>, %26, %cst_12 [0] : vector<16x2xf32> to vector<2xf32>
      %28 = vector.shape_cast %27 : vector<2xf32> to vector<1x2xf32>
      %29 = vector.broadcast %28 : vector<1x2xf32> to vector<16x2xf32>
      %30 = arith.divf %26, %29 : vector<16x2xf32>
      %c0_13 = arith.constant 0 : index
      %c0_14 = arith.constant 0 : index
      %c0_15 = arith.constant 0 : index
      %31 = vector.load %arg4[%c0_13, %c0_14, %c0_15] : memref<1x16x2xf32, #tpu.memory_space<vmem>>, vector<1x16x2xf32>
      %32 = vector.shape_cast %31 : vector<1x16x2xf32> to vector<16x2xf32>
      %33 = vector.shape_cast %30 : vector<16x2xf32> to vector<1x16x2xf32>
      tpu.vector_store %arg4[%c0_13, %c0_14, %c0_15], %33 {strides = array<i32>} : memref<1x16x2xf32, #tpu.memory_space<vmem>>, vector<1x16x2xf32>,
    } else {
    }
    return
  }
  func.func @transform_0(%arg0: i32, %arg1: i32) -> (i32, i32) {
    %c0_i32 = arith.constant 0 : i32
    %c0_i32_0 = arith.constant 0 : i32
    return %arg0, %c0_i32 : i32, i32
  }
  func.func @transform_1(%arg0: i32, %arg1: i32) -> (i32, i32, i32) {
    %c0_i32 = arith.constant 0 : i32
    %c0_i32_0 = arith.constant 0 : i32
    return %arg1, %arg0, %c0_i32 : i32, i32, i32
  }
  func.func @transform_2(%arg0: i32, %arg1: i32) -> (i32, i32, i32) {
    %c0_i32 = arith.constant 0 : i32
    %c0_i32_0 = arith.constant 0 : i32
    %c0_i32_1 = arith.constant 0 : i32
    return %arg0, %c0_i32, %c0_i32_0 : i32, i32, i32
  }
}

</mosaic_0001>

<bundles_post_ra>
// kernel: tpu_custom_call.1
= control target key start
LH: loop header
LB: loop body
LE: loop exit
PB: predicated region body
PF: predicated region fallthrough
CT: control target
= control target key end

     0   :  { %7 = vsyncpa [#allocation3], 0  ;;  %s408_s0 = inlined_call_operand.hbm [shape: f32[2,32], index: 0, kind: input, shape index: {}]   ;;  %s409_s1 = inlined_call_operand.hbm [shape: f32[10,2,32], index: 1, kind: input, shape index: {}]   ;;  %s410_s2 = inlined_call_operand.vmem [shape: f32[1,16,2], index: 2, kind: output, shape index: {}]  }
   0x1   :  { %8 = vsyncpa [#allocation5], 0  ;;  %s331_s9 = smov [#allocation2]  }
   0x2   :  { %s15_s10 = sshll.u32 %s331_s9, 4  ;;  %s16_s10 = int_to_ptr.vmem [resolvable:$true] %s15_s10 }
   0x3   :  { %s295_s11 = scalar_lea.vmem %s16_s10, 32  ;;  %p300_p1 = scmp.lt.s32.totalorder %s16_s10, %s16_s10 }
   0x4   :  { %p296_p0 = scmp.ne.s32.totalorder %s16_s10, %s295_s11  ;;  %p301_p2 = scmp.lt.s32.totalorder %s295_s11, %s295_s11 }
   0x6   :  { %p302_p3 = por %p301_p2, %p300_p1 }
   0x8   :  { %p303_p4 = pnand %p302_p3, %p296_p0 }
   0xa   :  { %306 = shalt.err (!%p303_p4)
}
   0xb   :  { %18 = dma.hbm_to_vmem [thread:$0]  %s408_s0, 32, %s16_s10, [#allocation3]  }
   0xc   :  { %23 = vsyncadd [#allocation5], 192  ;;  %s332_s14 = smov [#allocation4]  }
   0xd   :  { %s24_s15 = sshll.u32 %s332_s14, 4  ;;  %s25_s15 = int_to_ptr.vmem [resolvable:$true] %s24_s15 }
   0xe   :  { %s315_s16 = scalar_lea.vmem %s25_s15, 320  ;;  %s319_s17 = scalar_lea.vmem %s25_s15, 512 }
   0xf   :  { %p316_p5 = scmp.ne.s32.totalorder %s25_s15, %s315_s16  ;;  %p320_p6 = scmp.lt.s32.totalorder %s25_s15, %s25_s15 }
  0x10   :  { %p321_p7 = scmp.lt.s32.totalorder %s319_s17, %s315_s16 }
  0x12   :  { %p322_p8 = por %p321_p7, %p320_p6 }
  0x14   :  { %p323_p9 = pnand %p322_p8, %p316_p5 }
  0x16   :  { %326 = shalt.err (!%p323_p9)
}
  0x17   :  { %s333_s18 = smov 32   ;;  %s334_s19 = smov 2  }
  0x18   :  { %30 = dma.hbm_to_vmem [thread:$0]  %s409_s1, 320, %s25_s15, [#allocation5], %s333_s18, %s333_s18, %s334_s19  }
  0x19   :  { %327 = dma.done.wait [#allocation3], 32  }
  0x1a   :  { %328 = vsyncadd [#allocation3], 4294967264 }
  0x1b   :  { %329 = dma.done.wait [#allocation5], 512  }
  0x1c   :  { %330 = vsyncadd [#allocation5], 4294966784  ;;  %vm70_vm0 = vcmask 254976   ;;  %v45_v0 = vld [vmem:[#allocation4 + $0x10] sm:$0x3]  ;;  %v136_v55 = vlaneseq  ;;  %vm202_vm1 = vcmask 1041409  }
  0x1d   :  { %v53_v1 = vld [vmem:[#allocation2] sm:$0x3]  ;;  %v37_v2 = vld [vmem:[#allocation4] sm:$0x3]  ;;  %v46_v5 = vld [vmem:[#allocation4 + $0x12] sm:$0x3] }
  0x1e   :  { %v62_v3 = vmul.f32 %v53_v1, %v45_v0  ;;  %v54_v4 = vmul.f32 %v53_v1, %v37_v2  ;;  %v38_v6 = vld [vmem:[#allocation4 + $0x2] sm:$0x3]  ;;  %v63_v7 = vmul.f32 %v53_v1, %v46_v5  ;;  %v47_v9 = vld [vmem:[#allocation4 + $0x14] sm:$0x3]  ;;  %v39_v10 = vld [vmem:[#allocation4 + $0x4] sm:$0x3] }
  0x1f   :  { %v55_v8 = vmul.f32 %v53_v1, %v38_v6  ;;  %v64_v15 = vmul.f32 %v53_v1, %v47_v9  ;;  %v56_v16 = vmul.f32 %v53_v1, %v39_v10  ;;  %v48_v17 = vld [vmem:[#allocation4 + $0x16] sm:$0x3]  ;;  %v40_v18 = vld [vmem:[#allocation4 + $0x6] sm:$0x3]  ;;  %v49_v23 = vld [vmem:[#allocation4 + $0x18] sm:$0x3] }
  0x20   :  { %v95_v11 = vsel %vm70_vm0, %v62_v3, 0.0  ;;  %v71_v12 = vsel %vm70_vm0, %v54_v4, 0.0  ;;  %v98_v13 = vsel %vm70_vm0, %v63_v7, 0.0  ;;  %v65_v21 = vmul.f32 %v53_v1, %v48_v17  ;;  %v41_v24 = vld [vmem:[#allocation4 + $0x8] sm:$0x3] }
  0x21   :  { %96 = vadd.xlane.f32.xlu0 %v95_v11  ;;  %72 = vadd.xlane.f32.xlu1 %v71_v12  ;;  %v74_v14 = vsel %vm70_vm0, %v55_v8, 0.0  ;;  %v101_v19 = vsel %vm70_vm0, %v64_v15, 0.0  ;;  %v77_v20 = vsel %vm70_vm0, %v56_v16, 0.0  ;;  %v57_v22 = vmul.f32 %v53_v1, %v40_v18  ;;  %v50_v29 = vld [vmem:[#allocation4 + $0x1a] sm:$0x3] }
  0x22   :  { %v104_v25 = vsel %vm70_vm0, %v65_v21, 0.0  ;;  %v66_v27 = vmul.f32 %v53_v1, %v49_v23  ;;  %v58_v28 = vmul.f32 %v53_v1, %v41_v24  ;;  %v42_v30 = vld [vmem:[#allocation4 + $0xa] sm:$0x3]  ;;  %v67_v33 = vmul.f32 %v53_v1, %v50_v29  ;;  %v51_v35 = vld [vmem:[#allocation4 + $0x1c] sm:$0x3] }
  0x23   :  { %v80_v26 = vsel %vm70_vm0, %v57_v22, 0.0  ;;  %v59_v34 = vmul.f32 %v53_v1, %v42_v30  ;;  %v43_v36 = vld [vmem:[#allocation4 + $0xc] sm:$0x3]  ;;  %v68_v39 = vmul.f32 %v53_v1, %v51_v35  ;;  %v52_v41 = vld [vmem:[#allocation4 + $0x1e] sm:$0x3]  ;;  %v137_v58 = vand.u32 127, %v136_v55 }
  0x24   :  { %v107_v31 = vsel %vm70_vm0, %v66_v27, 0.0  ;;  %v83_v32 = vsel %vm70_vm0, %v58_v28, 0.0  ;;  %v110_v37 = vsel %vm70_vm0, %v67_v33, 0.0  ;;  %v60_v40 = vmul.f32 %v53_v1, %v43_v36  ;;  %v44_v42 = vld [vmem:[#allocation4 + $0xe] sm:$0x3] }
  0x25   :  { %99 = vadd.xlane.f32.xlu0 %v98_v13  ;;  %75 = vadd.xlane.f32.xlu1 %v74_v14  ;;  %v86_v38 = vsel %vm70_vm0, %v59_v34, 0.0  ;;  %v113_v43 = vsel %vm70_vm0, %v68_v39, 0.0  ;;  %v69_v45 = vmul.f32 %v53_v1, %v52_v41  ;;  %v61_v46 = vmul.f32 %v53_v1, %v44_v42 }
  0x26   :  { %v89_v44 = vsel %vm70_vm0, %v60_v40, 0.0  ;;  %v139_v59 = vshrl.u32 %v136_v55, 7  ;;  %vm204_vm2 = vcmask 1042434   ;;  %vm206_vm3 = vcmask 1043459  }
  0x27   :  { %v116_v47 = vsel %vm70_vm0, %v69_v45, 0.0  ;;  %v92_v48 = vsel %vm70_vm0, %v61_v46, 0.0  ;;  %vm208_vm4 = vcmask 1044484   ;;  %vm210_vm5 = vcmask 1045509  }
  0x28   :  { %v140_v62 = vsub.s32 %v137_v58, %v139_v59  ;;  %vm212_vm6 = vcmask 1046534   ;;  %vm214_vm7 = vcmask 1047559   ;;  %vm226_vm8 = vcmask 15360  }
  0x29   :  { %102 = vadd.xlane.f32.xlu0 %v101_v19  ;;  %78 = vadd.xlane.f32.xlu1 %v77_v20  ;;  %v237_v35 = vadd.s32 8, %v139_v59 }
  0x2b   :  { %vm239_vm9 = vcmp.lt.s32.totalorder %v237_v35, 10 }
  0x2d   :  { %105 = vadd.xlane.f32.xlu0 %v104_v25  ;;  %81 = vadd.xlane.f32.xlu1 %v80_v26 }
  0x31   :  { %108 = vadd.xlane.f32.xlu0 %v107_v31  ;;  %84 = vadd.xlane.f32.xlu1 %v83_v32 }
  0x35   :  { %111 = vadd.xlane.f32.xlu0 %v110_v37  ;;  %87 = vadd.xlane.f32.xlu1 %v86_v38 }
  0x39   :  { %114 = vadd.xlane.f32.xlu0 %v113_v43  ;;  %90 = vadd.xlane.f32.xlu1 %v89_v44 }
  0x3d   :  { %117 = vadd.xlane.f32.xlu0 %v116_v47  ;;  %93 = vadd.xlane.f32.xlu1 %v92_v48 }
  0xaa   :  { %v97_v49 = vpop.xlane.xlu0 %96  ;;  %v73_v50 = vpop.xlane.xlu1 %72 }
  0xab   :  { %v173_v5 = vrot.slane %v97_v49, %v140_v62  ;;  %v141_v6 = vrot.slane %v73_v50, %v140_v62 }
  0xae   :  { %v100_v51 = vpop.xlane.xlu0 %99  ;;  %v76_v52 = vpop.xlane.xlu1 %75 }
  0xaf   :  { %v177_v1 = vrot.slane %v100_v51, %v140_v62  ;;  %v145_v2 = vrot.slane %v76_v52, %v140_v62 }
  0xb1   :  { %v216_v13 = vsel %vm202_vm1, %v177_v1, %v173_v5  ;;  %v203_v14 = vsel %vm202_vm1, %v145_v2, %v141_v6 }
  0xb2   :  { %v103_v53 = vpop.xlane.xlu0 %102  ;;  %v79_v54 = vpop.xlane.xlu1 %78 }
  0xb3   :  { %v181_v3 = vrot.slane %v103_v53, %v140_v62  ;;  %v149_v4 = vrot.slane %v79_v54, %v140_v62 }
  0xb5   :  { %v217_v17 = vsel %vm204_vm2, %v181_v3, %v216_v13  ;;  %v205_v18 = vsel %vm204_vm2, %v149_v4, %v203_v14 }
  0xb6   :  { %v106_v56 = vpop.xlane.xlu0 %105  ;;  %v82_v57 = vpop.xlane.xlu1 %81 }
  0xb7   :  { %v185_v7 = vrot.slane %v106_v56, %v140_v62  ;;  %v153_v8 = vrot.slane %v82_v57, %v140_v62 }
  0xb9   :  { %v218_v21 = vsel %vm206_vm3, %v185_v7, %v217_v17  ;;  %v207_v22 = vsel %vm206_vm3, %v153_v8, %v205_v18 }
  0xba   :  { %v109_v60 = vpop.xlane.xlu0 %108  ;;  %v85_v61 = vpop.xlane.xlu1 %84 }
  0xbb   :  { %v189_v9 = vrot.slane %v109_v60, %v140_v62  ;;  %v157_v10 = vrot.slane %v85_v61, %v140_v62 }
  0xbd   :  { %v219_v23 = vsel %vm208_vm4, %v189_v9, %v218_v21  ;;  %v209_v24 = vsel %vm208_vm4, %v157_v10, %v207_v22 }
  0xbe   :  { %v112_v63 = vpop.xlane.xlu0 %111  ;;  %v88_v0 = vpop.xlane.xlu1 %87 }
  0xbf   :  { %v193_v15 = vrot.slane %v112_v63, %v140_v62  ;;  %v161_v16 = vrot.slane %v88_v0, %v140_v62 }
  0xc1   :  { %v220_v27 = vsel %vm210_vm5, %v193_v15, %v219_v23  ;;  %v211_v28 = vsel %vm210_vm5, %v161_v16, %v209_v24 }
  0xc2   :  { %v115_v11 = vpop.xlane.xlu0 %114  ;;  %v91_v12 = vpop.xlane.xlu1 %90 }
  0xc3   :  { %v197_v19 = vrot.slane %v115_v11, %v140_v62  ;;  %v165_v20 = vrot.slane %v91_v12, %v140_v62 }
  0xc5   :  { %v221_v31 = vsel %vm212_vm6, %v197_v19, %v220_v27  ;;  %v213_v32 = vsel %vm212_vm6, %v165_v20, %v211_v28 }
  0xc6   :  { %v118_v25 = vpop.xlane.xlu0 %117  ;;  %v94_v26 = vpop.xlane.xlu1 %93 }
  0xc7   :  { %v201_v29 = vrot.slane %v118_v25, %v140_v62  ;;  %v169_v30 = vrot.slane %v94_v26, %v140_v62 }
  0xc9   :  { %v222_v33 = vsel %vm214_vm7, %v201_v29, %v221_v31  ;;  %v215_v34 = vsel %vm214_vm7, %v169_v30, %v213_v32 }
  0xca   :  { %228 = vst.msk [vmem:[%s410_s2 + $0x8] sm:$0xff] %vm226_vm8, %v222_v33  ;;  %227 = vst.msk [vmem:[%s410_s2] sm:$0xff] %vm226_vm8, %v215_v34 }
  0xd1   :  { %v234_v36 = vld [vmem:[%s410_s2 + $0x8] sm:$0xff]  ;;  %v233_v37 = vld [vmem:[%s410_s2] sm:$0xff] }
  0xd2   :  { %v241_v38 = vsel %vm239_vm9, %v234_v36, -inf  ;;  %v242_v39 = vsel %vm226_vm8, %v233_v37, -inf }
  0xd3   :  { %v243_v40 = vsel %vm226_vm8, %v241_v38, -inf }
  0xd4   :  { %v244_v41 = vmax.f32 %v242_v39, %v243_v40 }
  0xd6   :  { %v245_v42 = vrot.slane %v244_v41, 4 }
  0xd8   :  { %v246_v43 = vmax.f32 %v244_v41, %v245_v42 }
  0xda   :  { %v247_v44 = vrot.slane %v246_v43, 2 }
  0xdc   :  { %v248_v45 = vmax.f32 %v246_v43, %v247_v44 }
  0xde   :  { %v249_v46 = vrot.slane %v248_v45, 1 }
  0xe0   :  { %v250_v47 = vmax.f32 %v248_v45, %v249_v46 }
  0xe2   :  { %v251_v48 = vsub.f32 %v233_v37, %v250_v47  ;;  %v252_v49 = vsub.f32 %v241_v38, %v250_v47 }
  0xe4   :  { %v253_v50 = vmul.f32 1.442695, %v251_v48  ;;  %v255_v51 = vmul.f32 1.442695, %v252_v49 }
  0xe6   :  { %281 = vpow2.f32 %v253_v50 }
  0xe7   :  { %283 = vpow2.f32 %v255_v51 }
  0xf3   :  { %v282_v52 = vpop.eup %281 }
  0xf4   :  { %v284_v53 = vpop.eup %283  ;;  %v257_v54 = vsel %vm226_vm8, %v282_v52, 0.0 }
  0xf5   :  { %v258_v55 = vsel %vm226_vm8, %v284_v53, 0.0 }
  0xf6   :  { %v259_v56 = vadd.f32 %v258_v55, %v257_v54 }
  0xf8   :  { %v260_v57 = vrot.slane %v259_v56, 4 }
  0xfa   :  { %v261_v58 = vadd.f32 %v260_v57, %v259_v56 }
  0xfc   :  { %v262_v59 = vrot.slane %v261_v58, 2 }
  0xfe   :  { %v263_v60 = vadd.f32 %v262_v59, %v261_v58 }
 0x100   :  { %v264_v61 = vrot.slane %v263_v60, 1 }
 0x102   :  { %v265_v62 = vadd.f32 %v264_v61, %v263_v60 }
 0x104   :  { %285 = vrcp.f32 %v265_v62 }
 0x111   :  { %v286_v63 = vpop.eup %285 }
 0x112   :  { %v267_v0 = vmul.f32 %v286_v63, %v282_v52  ;;  %v268_v1 = vmul.f32 %v286_v63, %v284_v53 }
 0x114   :  { %269 = vst.msk [vmem:[%s410_s2] sm:$0xff] %vm226_vm8, %v267_v0  ;;  %270 = vst.msk [vmem:[%s410_s2 + $0x8] sm:$0xff] %vm226_vm8, %v268_v1 }
 0x115   :  { %275 = vsyncpa [#allocation3], 1 }
 0x116   :  { %276 = vsyncpa [#allocation5], 1 }

</bundles_post_ra>
